<compile_context>
chip_gen: v5e
topology: v5e:2x2
jax: 0.10.0
libtpu: 0.0.40
codegen_flags: <defaults>
</compile_context>

<pallas_src>
import functools

import jax
import jax.numpy as jnp
from jax.experimental import pallas as pl
from jax.experimental.pallas import tpu as pltpu


VMEM_LIMIT_BYTES = 48 * 1024 * 1024     # v7x-safe (64 MiB physical / 32 default)


# ----------------------------------------------------------------------------
# Helpers
# ----------------------------------------------------------------------------
def round_up(x, m):
    return ((x + m - 1) // m) * m


def _choose_tile(d, cap):
    """Largest multiple-of-128 divisor of d (d % 128 == 0) that is <= cap."""
    t = min(cap, d)
    t -= t % 128
    while t > 128:
        if d % t == 0:
            return t
        t -= 128
    return 128


def _choose_tm(m):
    for t in (512, 256, 128):
        if m % t == 0:
            return t
    return m          # caller already rounded m to a multiple of 8; one block


def _choose_row_tile(npix):
    if npix >= 16384:
        return 512
    if npix >= 4096:
        return 256
    return 128


# ----------------------------------------------------------------------------
# Pallas kernel 1: fused 3x3 conv  (tap-shifted matmul, no im2col)
#   out = mask * act((sum_t x_shift_t @ W_t) + shift [+ residual])
# x is the whole padded-flat activation slab resident in VMEM; the 9 taps are
# static shifted slices of one aligned halo'd window.
# ----------------------------------------------------------------------------
def _conv3x3_kernel(*refs, tm, hw, taps, cp, relu, has_res):
    if has_res:
        x_ref, w_ref, s_ref, m_ref, r_ref, o_ref = refs
    else:
        x_ref, w_ref, s_ref, m_ref, o_ref = refs
        r_ref = None

    i = pl.program_id(1)
    rtot = x_ref.shape[0]
    win = tm + 2 * hw

    # Aligned dynamic window [base, base+win).  The clamps only shift blocks
    # that are entirely padding rows (their outputs are masked to zero).
    base = i * tm - hw
    base = jnp.maximum(base, 0)
    base = jnp.minimum(base, rtot - win)
    base = pl.multiple_of(base, 16)
    xwin = x_ref[pl.ds(base, win), :]          # (win, Cp) bf16

    acc = None
    for t, off in enumerate(taps):             # 9 static taps, fully unrolled
        lo = hw + off                          # static offset inside the window
        xs = xwin[lo:lo + tm, :]
        wt = w_ref[0, t * cp:(t + 1) * cp, :]
        d = jnp.dot(xs, wt, preferred_element_type=jnp.float32)
        acc = d if acc is None else acc + d

    out = acc + s_ref[...]                     # folded-BN shift, (1, tn)
    if r_ref is not None:
        out = out + r_ref[...].astype(jnp.float32)
    if relu:
        out = jnp.maximum(out, 0.0)
    out = out * m_ref[...]                     # zero border ring (conv padding)
    o_ref[...] = out.astype(o_ref.dtype)


def conv3x3_bn_act(xbuf, w_blk, shift, mask, *, tm, wp_stride,
                   residual=None, relu=True):
    """xbuf: (R, Cp) bf16 padded-flat activations; w_blk: (Nb, 9*Cp, tn) bf16."""
    R, Cp = xbuf.shape
    Nb, K9, tn = w_blk.shape
    assert K9 == 9 * Cp, (K9, Cp)
    assert R % tm == 0
    Np = Nb * tn

    hw = round_up(wp_stride + 1, 16)           # halo rows (>= Wp+1, 16-aligned)
    assert hw <= tm, "row tile must cover the 3x3 halo"
    taps = tuple((ki - 1) * wp_stride + (kj - 1)
                 for ki in range(3) for kj in range(3))

    in_specs = [
        pl.BlockSpec((R, Cp), lambda j, i: (0, 0)),        # resident activations
        pl.BlockSpec((1, K9, tn), lambda j, i: (j, 0, 0)),  # contiguous W tile
        pl.BlockSpec((1, tn), lambda j, i: (0, j)),         # BN shift
        pl.BlockSpec((tm, 1), lambda j, i: (i, 0)),         # border mask column
    ]
    args = [xbuf, w_blk, shift, mask]
    if residual is not None:
        assert residual.shape == (R, Np), (residual.shape, (R, Np))
        in_specs.append(pl.BlockSpec((tm, tn), lambda j, i: (i, j)))
        args.append(residual)

    kernel = functools.partial(_conv3x3_kernel, tm=tm, hw=hw, taps=taps,
                               cp=Cp, relu=relu, has_res=residual is not None)
    return pl.pallas_call(
        kernel,
        out_shape=jax.ShapeDtypeStruct((R, Np), jnp.bfloat16),
        grid_spec=pltpu.PrefetchScalarGridSpec(
            num_scalar_prefetch=0,
            grid=(Nb, R // tm),
            in_specs=in_specs,
            out_specs=pl.BlockSpec((tm, tn), lambda j, i: (i, j))),
        compiler_params=pltpu.CompilerParams(
            dimension_semantics=("parallel", "parallel"),
            vmem_limit_bytes=VMEM_LIMIT_BYTES),
    )(*args)


# ----------------------------------------------------------------------------
# Pallas kernel 2: plain fused matmul + shift + optional ReLU
#   (1x1 upsample conv and the final FC layer)
# ----------------------------------------------------------------------------
def _matmul_kernel(x_ref, w_ref, s_ref, o_ref, acc_ref, *, relu):
    kk = pl.program_id(2)

    @pl.when(kk == 0)
    def _init():
        acc_ref[...] = jnp.zeros_like(acc_ref)

    acc_ref[...] += jnp.dot(x_ref[...], w_ref[0],
                            preferred_element_type=jnp.float32)

    @pl.when(kk == pl.num_programs(2) - 1)
    def _fin():
        out = acc_ref[...] + s_ref[...]
        if relu:
            out = jnp.maximum(out, 0.0)
        o_ref[...] = out.astype(o_ref.dtype)


def matmul_bias_act(x, w_blk, shift, relu=False, out_dtype=jnp.bfloat16):
    """x: (M, K); w_blk: (Nb, Kp, tn) pre-blocked bf16 (Kp >= K, zero padded)."""
    M, K = x.shape
    Nb, Kp, tn = w_blk.shape
    Np = Nb * tn

    tk = _choose_tile(Kp, 1024)
    Mp0 = round_up(M, 8)
    tm = _choose_tm(Mp0)
    Mp = round_up(Mp0, tm)

    xb = x.astype(jnp.bfloat16)
    if Mp != M or Kp != K:
        xb = jnp.pad(xb, ((0, Mp - M), (0, Kp - K)))

    out = pl.pallas_call(
        functools.partial(_matmul_kernel, relu=relu),
        out_shape=jax.ShapeDtypeStruct((Mp, Np), out_dtype),
        grid_spec=pltpu.PrefetchScalarGridSpec(
            num_scalar_prefetch=0,
            grid=(Nb, Mp // tm, Kp // tk),
            in_specs=[pl.BlockSpec((tm, tk), lambda j, i, kk: (i, kk)),
                      pl.BlockSpec((1, tk, tn), lambda j, i, kk: (j, kk, 0)),
                      pl.BlockSpec((1, tn), lambda j, i, kk: (0, j))],
            out_specs=pl.BlockSpec((tm, tn), lambda j, i, kk: (i, j)),
            scratch_shapes=[pltpu.VMEM((tm, tn), jnp.float32)]),
        compiler_params=pltpu.CompilerParams(
            dimension_semantics=("parallel", "parallel", "arbitrary"),
            vmem_limit_bytes=VMEM_LIMIT_BYTES),
    )(xb, w_blk, shift)
    return out


# ----------------------------------------------------------------------------
# Parameter initialization (raw, PyTorch-like) and offline folding / blocking
# ----------------------------------------------------------------------------
def bn_fold(bnp, conv_bias=None, eps=1e-5):
    inv = bnp["gamma"] / jnp.sqrt(bnp["var"] + eps)
    shift = bnp["beta"] - bnp["mean"] * inv
    if conv_bias is not None:
        shift = shift + conv_bias * inv
    return inv, shift


def _pad_shift(t, Np):
    t = t.reshape(1, -1).astype(jnp.float32)
    return jnp.pad(t, ((0, 0), (0, Np - t.shape[1])))


def _block_weight_matmul(w, tn=None):
    """(K, N) f32 -> (Nb, Kp, tn) bf16, contiguous per output-tile."""
    K, N = w.shape
    Kp, Np = round_up(K, 128), round_up(N, 128)
    if tn is None:
        tn = _choose_tile(Np, 512)
    wp = jnp.pad(w, ((0, Kp - K), (0, Np - N)))
    wb = wp.reshape(Kp, Np // tn, tn).transpose(1, 0, 2)
    return wb.astype(jnp.bfloat16)


def _block_weight_conv3(w, s):
    """(9*cin, cout) raw conv weight, BN scale s -> (Nb, 9*Cp, tn) bf16."""
    K, cout = w.shape
    cin = K // 9
    Cp = round_up(cin, 128)
    Np = round_up(cout, 128)
    tn = _choose_tile(Np, 512)
    w9 = w.reshape(9, cin, cout) * s[None, None, :]
    w9 = jnp.pad(w9, ((0, 0), (0, Cp - cin), (0, Np - cout)))
    wk = w9.reshape(9 * Cp, Np)
    wb = wk.reshape(9 * Cp, Np // tn, tn).transpose(1, 0, 2)
    return wb.astype(jnp.bfloat16)


def init_params(key, color_dim, num_classes, scatter_size, base=256, k=1):
    keys = iter(jax.random.split(key, 512))

    def nk():
        return next(keys)

    def conv3x3_w(cin, cout):
        w = jax.random.normal(nk(), (3, 3, cin, cout), jnp.float32)
        w = w * (2.0 / (9 * cin)) ** 0.5
        return w.reshape(9 * cin, cout)     # tap-major (ki,kj), then cin

    def conv1x1_p(cin, cout):
        w = jax.random.normal(nk(), (cin, cout), jnp.float32) * (1.0 / cin) ** 0.5
        b = 0.01 * jax.random.normal(nk(), (cout,), jnp.float32)
        return w, b

    def bn(c):
        return dict(
            gamma=1.0 + 0.05 * jax.random.normal(nk(), (c,), jnp.float32),
            beta=0.05 * jax.random.normal(nk(), (c,), jnp.float32),
            mean=0.05 * jax.random.normal(nk(), (c,), jnp.float32),
            var=0.5 + 0.5 * jnp.abs(jax.random.normal(nk(), (c,), jnp.float32)),
        )

    def make_layer(planes, conv_planes, out_planes, blocks):
        layer = dict(blocks=[], upsample=None)
        if planes < out_planes:
            assert blocks == 1, "upsample layers must have exactly one block"
            w, b = conv1x1_p(planes, out_planes)
            layer["upsample"] = dict(w=w, b=b, bn=bn(out_planes))
        assert not (planes > out_planes and out_planes % planes != 0), \
            "downsample branch not implemented for this configuration"
        for _ in range(blocks):
            layer["blocks"].append(dict(
                w1=conv3x3_w(planes, conv_planes), bn1=bn(conv_planes),
                w2=conv3x3_w(conv_planes, out_planes), bn2=bn(out_planes)))
        return layer

    B = base
    params = dict(
        bn0=dict(mean=0.05 * jax.random.normal(nk(), (color_dim,), jnp.float32),
                 var=0.5 + 0.5 * jnp.abs(jax.random.normal(nk(), (color_dim,),
                                                           jnp.float32))),
        layers=[
            make_layer(color_dim, B * k, B * k, 1),        # layer3
            make_layer(B * k, B, B * k, 3),                # layer4
            make_layer(B * k, 2 * B, 2 * B * k, 1),        # layer5
            make_layer(2 * B * k, 2 * B, 2 * B * k, 4),    # layer6
            make_layer(2 * B * k, 4 * B, 4 * B * k, 1),    # layer7
            make_layer(4 * B * k, 4 * B, 4 * B * k, 2),    # layer8
        ],
    )
    pooling_coef = int(scatter_size / 5)
    after = int(scatter_size / pooling_coef)
    F = 4 * B * k * after * after
    fc_w = jax.random.normal(nk(), (F, num_classes), jnp.float32) * (1.0 / F) ** 0.5
    fc_b = 0.01 * jax.random.normal(nk(), (num_classes,), jnp.float32)
    params["fc"] = dict(w=fc_w, b=fc_b)
    params["pooling_coef"] = pooling_coef
    params["num_classes"] = num_classes
    params["c_final"] = 4 * B * k
    return params


def prepare_params(params, eps=1e-5):
    """Fold BatchNorms into conv weights/shifts, cast bf16, pre-block once."""
    prepared_layers = []
    for layer in params["layers"]:
        pup = None
        up = layer["upsample"]
        if up is not None:
            s_u, t_u = bn_fold(up["bn"], conv_bias=up["b"], eps=eps)
            w = up["w"] * s_u[None, :]
            Np = round_up(w.shape[1], 128)
            pup = dict(w=_block_weight_matmul(w), shift=_pad_shift(t_u, Np))

        pblocks = []
        for blk in layer["blocks"]:
            s1, t1 = bn_fold(blk["bn1"], eps=eps)
            s2, t2 = bn_fold(blk["bn2"], eps=eps)
            w1b = _block_weight_conv3(blk["w1"], s1)
            w2b = _block_weight_conv3(blk["w2"], s2)
            pblocks.append(dict(
                w1=w1b, t1=_pad_shift(t1, w1b.shape[0] * w1b.shape[2]),
                w2=w2b, t2=_pad_shift(t2, w2b.shape[0] * w2b.shape[2])))
        prepared_layers.append(dict(upsample=pup, blocks=pblocks))

    fc_wb = _block_weight_matmul(params["fc"]["w"])
    return dict(
        bn0=dict(mean=params["bn0"]["mean"], var=params["bn0"]["var"]),
        layers=prepared_layers,
        fc=dict(w=fc_wb,
                shift=_pad_shift(params["fc"]["b"],
                                 fc_wb.shape[0] * fc_wb.shape[2])),
        pooling_coef=params["pooling_coef"],
        num_classes=params["num_classes"],
        c_final=params["c_final"],
    )


# ----------------------------------------------------------------------------
# Padded-flat layout helpers
# ----------------------------------------------------------------------------
def _make_row_mask(N, H, W, tm, R):
    """1.0 for interior pixel rows, 0.0 for halo / spatial-border rows."""
    Hp, Wp = H + 2, W + 2
    npix = N * Hp * Wp
    r = jnp.arange(R, dtype=jnp.int32)
    p = r - tm
    inpix = (p >= 0) & (p < npix)
    q = jnp.where(inpix, p, 0) % (Hp * Wp)
    hp = q // Wp
    wp = q % Wp
    interior = (hp >= 1) & (hp <= H) & (wp >= 1) & (wp <= W)
    return (inpix & interior).astype(jnp.float32).reshape(R, 1)


# ----------------------------------------------------------------------------
# Forward pass (mirrors ResNetShort.forward, inference semantics)
# ----------------------------------------------------------------------------
def resnet_short_forward(prepared, x, color_dim, scatter_size):
    N = x.shape[0]
    S = scatter_size
    Hp = Wp = S + 2

    # x.view(N, C, S, S) -> NHWC, bn0 (affine=False, running stats; exact).
    x = x.reshape(N, color_dim, S, S)
    x = jnp.transpose(x, (0, 2, 3, 1))
    bn0 = prepared["bn0"]
    x = (x - bn0["mean"]) * jax.lax.rsqrt(bn0["var"] + 1e-5)

    # Pack into the padded-flat layout once (spatial zero border + TM top halo).
    npix = N * Hp * Wp
    tm = _choose_row_tile(npix)
    R = ((npix + tm - 1) // tm + 2) * tm
    mask = _make_row_mask(N, S, S, tm, R)

    Cp0 = round_up(color_dim, 128)
    xp = jnp.pad(x, ((0, 0), (1, 1), (1, 1), (0, Cp0 - color_dim)))
    xbuf = jnp.pad(xp.reshape(npix, Cp0),
                   ((tm, R - tm - npix), (0, 0))).astype(jnp.bfloat16)

    for layer in prepared["layers"]:
        up = layer["upsample"]
        for bi, blk in enumerate(layer["blocks"]):
            if up is not None and bi == 0:
                residual = matmul_bias_act(xbuf, up["w"], up["shift"],
                                           relu=False, out_dtype=jnp.bfloat16)
            else:
                residual = xbuf
            h = conv3x3_bn_act(xbuf, blk["w1"], blk["t1"], mask,
                               tm=tm, wp_stride=Wp, residual=None, relu=True)
            xbuf = conv3x3_bn_act(h, blk["w2"], blk["t2"], mask,
                                  tm=tm, wp_stride=Wp, residual=residual,
                                  relu=True)

    # Unpack valid pixels, avgpool (tiny, plain jnp per reviewer), NCHW flatten,
    # then the FC matmul kernel.
    Cf = prepared["c_final"]
    feat = xbuf[tm:tm + npix, :Cf].astype(jnp.float32)
    feat = feat.reshape(N, Hp, Wp, Cf)[:, 1:S + 1, 1:S + 1, :]

    p = prepared["pooling_coef"]
    Ho = S // p
    pooled = feat[:, :Ho * p, :Ho * p, :].reshape(N, Ho, p, Ho, p, Cf)
    pooled = pooled.mean(axis=(2, 4))                       # (N, Ho, Ho, Cf)
    flat = jnp.transpose(pooled, (0, 3, 1, 2)).reshape(N, -1)

    fc = prepared["fc"]
    logits = matmul_bias_act(flat, fc["w"], fc["shift"], relu=False,
                             out_dtype=jnp.float32)
    return logits[:N, :prepared["num_classes"]]


# ----------------------------------------------------------------------------
if __name__ == "__main__":
    key = jax.random.PRNGKey(0)
    k_param, k_input = jax.random.split(key)

    batch, color_dim, scatter_size, num_classes = 2, 4, 10, 10
    # Small-shape demo: `base` stands in for the original width of 256 (widths
    # become base, 2*base, 4*base).  Set base=256 for the full, lane-dense model.
    base, kmul = 32, 1

    params = init_params(k_param, color_dim, num_classes, scatter_size,
                         base=base, k=kmul)
    prepared = prepare_params(params)

    x = jax.random.normal(k_input,
                          (batch, color_dim, scatter_size, scatter_size),
                          jnp.float32)

    out = resnet_short_forward(prepared, x, color_dim, scatter_size)
    out = jax.block_until_ready(out)
    assert out.shape == (batch, num_classes), out.shape
    assert jnp.all(jnp.isfinite(out))
    print("KERNEL_OK")
</pallas_src>

<mosaic_0001>
module attributes {stable_mosaic.version = 11 : i64} {
  func.func @_matmul_kernel(%arg0: i32, %arg1: i32, %arg2: i32, %arg3: memref<128x128xbf16, #tpu.memory_space<vmem>>, %arg4: memref<1x128x128xbf16, #tpu.memory_space<vmem>>, %arg5: memref<1x128xf32, #tpu.memory_space<vmem>>, %arg6: memref<128x128xbf16, #tpu.memory_space<vmem>>, %arg7: memref<128x128xf32, #tpu.memory_space<vmem>>) attributes {dimension_semantics = [#tpu.dimension_semantics<parallel>, #tpu.dimension_semantics<parallel>, #tpu.dimension_semantics<arbitrary>], iteration_bounds = array<i64: 1, 5, 1>, scalar_prefetch = 0 : i64, scratch_operands = 1 : i64, tpu.core_type = #tpu.core_type<tc>, window_params = [{transform_indices = @transform_0, window_bounds = array<i64: 128, 128>}, {transform_indices = @transform_1, window_bounds = array<i64: 1, 128, 128>}, {transform_indices = @transform_2, window_bounds = array<i64: 1, 128>}, {transform_indices = @transform_3, window_bounds = array<i64: 128, 128>}]} {
    %c0_i32 = arith.constant 0 : i32
    %0 = arith.cmpi eq, %arg2, %c0_i32 : i32
    %1 = arith.extui %0 : i1 to i32
    %c0_i32_0 = arith.constant 0 : i32
    %2 = arith.cmpi ne, %1, %c0_i32_0 : i32
    scf.if %2 {
      %cst_11 = arith.constant 0.000000e+00 : f32
      %13 = vector.broadcast %cst_11 : f32 to vector<128x128xf32>
      %c0_12 = arith.constant 0 : index
      %c0_13 = arith.constant 0 : index
      %14 = vector.load %arg7[%c0_12, %c0_13] : memref<128x128xf32, #tpu.memory_space<vmem>>, vector<128x128xf32>
      tpu.vector_store %arg7[%c0_12, %c0_13], %13 {strides = array<i32>} : memref<128x128xf32, #tpu.memory_space<vmem>>, vector<128x128xf32>,
    } else {
    }
    %c0 = arith.constant 0 : index
    %c0_1 = arith.constant 0 : index
    %3 = vector.load %arg7[%c0, %c0_1] : memref<128x128xf32, #tpu.memory_space<vmem>>, vector<128x128xf32>
    %c0_2 = arith.constant 0 : index
    %c0_3 = arith.constant 0 : index
    %4 = vector.load %arg3[%c0_2, %c0_3] : memref<128x128xbf16, #tpu.memory_space<vmem>>, vector<128x128xbf16>
    %c0_4 = arith.constant 0 : index
    %c0_5 = arith.constant 0 : index
    %c0_6 = arith.constant 0 : index
    %5 = vector.load %arg4[%c0_4, %c0_5, %c0_6] : memref<1x128x128xbf16, #tpu.memory_space<vmem>>, vector<1x128x128xbf16>
    %6 = vector.shape_cast %5 : vector<1x128x128xbf16> to vector<128x128xbf16>
    %cst = arith.constant dense<0.000000e+00> : vector<128x128xf32>
    %7 = tpu.matmul %4, %6, %cst {dimension_numbers = #tpu.dot_dimension_numbers<[1], [0], [0], [1], [0, 0, 1, 1], [], []>} : vector<128x128xbf16>, vector<128x128xbf16>, vector<128x128xf32> -> vector<128x128xf32>
    %8 = arith.addf %3, %7 : vector<128x128xf32>
    %c0_7 = arith.constant 0 : index
    %c0_8 = arith.constant 0 : index
    %9 = vector.load %arg7[%c0_7, %c0_8] : memref<128x128xf32, #tpu.memory_space<vmem>>, vector<128x128xf32>
    tpu.vector_store %arg7[%c0_7, %c0_8], %8 {strides = array<i32>} : memref<128x128xf32, #tpu.memory_space<vmem>>, vector<128x128xf32>,
    %c0_i32_9 = arith.constant 0 : i32
    %10 = arith.cmpi eq, %arg2, %c0_i32_9 : i32
    %11 = arith.extui %10 : i1 to i32
    %c0_i32_10 = arith.constant 0 : i32
    %12 = arith.cmpi ne, %11, %c0_i32_10 : i32
    scf.if %12 {
      %c0_11 = arith.constant 0 : index
      %c0_12 = arith.constant 0 : index
      %13 = vector.load %arg7[%c0_11, %c0_12] : memref<128x128xf32, #tpu.memory_space<vmem>>, vector<128x128xf32>
      %c0_13 = arith.constant 0 : index
      %c0_14 = arith.constant 0 : index
      %14 = vector.load %arg5[%c0_13, %c0_14] : memref<1x128xf32, #tpu.memory_space<vmem>>, vector<1x128xf32>
      %15 = vector.broadcast %14 : vector<1x128xf32> to vector<128x128xf32>
      %16 = arith.addf %13, %15 : vector<128x128xf32>
      %17 = arith.truncf %16 : vector<128x128xf32> to vector<128x128xbf16>
      %c0_15 = arith.constant 0 : index
      %c0_16 = arith.constant 0 : index
      %18 = vector.load %arg6[%c0_15, %c0_16] : memref<128x128xbf16, #tpu.memory_space<vmem>>, vector<128x128xbf16>
      tpu.vector_store %arg6[%c0_15, %c0_16], %17 {strides = array<i32>} : memref<128x128xbf16, #tpu.memory_space<vmem>>, vector<128x128xbf16>,
    } else {
    }
    return
  }
  func.func @transform_0(%arg0: i32, %arg1: i32, %arg2: i32) -> (i32, i32) {
    %c0_i32 = arith.constant 0 : i32
    return %arg1, %arg2 : i32, i32
  }
  func.func @transform_1(%arg0: i32, %arg1: i32, %arg2: i32) -> (i32, i32, i32) {
    %c0_i32 = arith.constant 0 : i32
    %c0_i32_0 = arith.constant 0 : i32
    return %arg0, %arg2, %c0_i32 : i32, i32, i32
  }
  func.func @transform_2(%arg0: i32, %arg1: i32, %arg2: i32) -> (i32, i32) {
    %c0_i32 = arith.constant 0 : i32
    %c0_i32_0 = arith.constant 0 : i32
    return %c0_i32, %arg0 : i32, i32
  }
  func.func @transform_3(%arg0: i32, %arg1: i32, %arg2: i32) -> (i32, i32) {
    %c0_i32 = arith.constant 0 : i32
    return %arg1, %arg0 : i32, i32
  }
}

</mosaic_0001>

<bundles_post_ra>
// kernel: tpu_custom_call.1
= control target key start
LH: loop header
LB: loop body
LE: loop exit
PB: predicated region body
PF: predicated region fallthrough
CT: control target
= control target key end

     0   :  { %s1312_s0 = inlined_call_operand.hbm [shape: bf16[640,128], index: 0, kind: input, shape index: {}]   ;;  %s1313_s1 = inlined_call_operand.hbm [shape: bf16[1,128,128], index: 1, kind: input, shape index: {}]   ;;  %s1314_s2 = inlined_call_operand.vmem [shape: f32[1,128], index: 2, kind: input, shape index: {}]   ;;  %s1315_s3 = inlined_call_operand.hbm [shape: bf16[640,128], index: 3, kind: output, shape index: {}]  }
   0x1   :  { %1317 = sst [smem:[#allocation12_spill]] %s1313_s1 }
   0x2   :  { %8 = vsyncpa [#allocation4], 0 }
   0x3   :  { %10 = vsyncpa [#allocation4 + $0x1], 0 }
   0x4   :  { %11 = vsyncpa [#allocation7], 0 }
   0x5   :  { %12 = vsyncpa [#allocation5], 0 }
   0x6   :  { %14 = vsyncpa [#allocation5 + $0x1], 0  ;;  %s1131_s12 = smov 0   ;;  %s1133_s13 = smov 0  }
   0x7   :  { %s1135_s14 = smov 0   ;;  %s1137_s15 = smov 0  }
   0x8   :  { %s1139_s16 = smov 0   ;;  %s1141_s17 = smov 0  }
   0x9 LB: > { %s709_s18 = sadd.s32 4294967295, %s1104_s17   ;;  %s710_s19 = sadd.s32 4294967294, %s1104_s17   ;;  %s1104_s17 = sphi %s1141_s17, %s20_s17   ;;  %s1100_s16 = sphi %s1139_s16, %s1331_s16   ;;  %s1096_s15 = sphi %s1137_s15, %s1330_s15   ;;  %s1092_s14 = sphi %s1135_s14, %s1329_s14   ;;  %s1088_s13 = sphi %s1133_s13, %s1328_s13   ;;  %s1084_s12 = sphi %s1131_s12, %s1327_s12  }
   0xa   : > { %p61_p0 = scmp.ne.s32.totalorder %s1088_s13, %s1084_s12  ;;  %p1165_p1 = scmp.eq.s32.totalorder %s709_s18, 0 }
   0xb   : > { %p1169_p2 = scmp.eq.s32.totalorder %s709_s18, 4  ;;  %p147_p3 = scmp.eq.s32.totalorder %s710_s19, 4 }
   0xc   : > { %p1175_p4 = por %p1165_p1, %p61_p0  ;;  %p711_p5 = scmp.ge.s32.totalorder %s1104_s17, 1 }
   0xd   : > { %p1180_p6 = por %p147_p3, %p61_p0  ;;  %p154_p7 = scmp.lt.s32.totalorder %s1104_s17, 6 }
   0xe   : > { %s1322_s1 = sld [smem:[#allocation12_spill]]  ;;  %s1106_s28 = smov [#allocation6]  }
   0xf   : > { %p1188_p8 = pnand %p711_p5, %p154_p7  ;;  %s172_s29 = sshll.u32 %s1106_s28, 4  ;;  %s173_s29 = int_to_ptr.vmem [resolvable:$true] %s172_s29 }
  0x10   : > { %s1316_s30 = smov 64   ;;  %s1108_s4 = smov 4  }
  0x11   : > { %p888_p9 = pneg %p1188_p8  ;;  %s35_s5 = sadd.s32 1, %s1100_s16 }
  0x12   : > { %p37_p11 = scmp.ge.s32.totalorder %s35_s5, 5  ;;  %s48_s6 = sadd.s32 1, %s1092_s14 }
  0x13   : > { %p889_p10 = pnand %p888_p9, %p1165_p1  ;;  %p55_p12 = scmp.ne.s32.totalorder %s1092_s14, %s1088_s13 }
  0x14   : > { %s170_s26 = sshll.u32 %s1322_s1, 4  ;;  %p56_p13 = scmp.eq.s32.totalorder %s1104_s17, 0  ;;  %s171_s26 = int_to_ptr.hbm [resolvable:$true] %s170_s26 }
  0x15   : > { %891 = dma.hbm_to_vmem [thread:$0]  (!%p889_p10), %s171_s26, 1024, %s173_s29, [#allocation7], %s1316_s30, %s1316_s30, %s1108_s4  }
  0x16   : > { %s1333_s5 = smov (%p37_p11, %s35_s5), 0  ;;  %p1206_p0 = por %p56_p13, %p55_p12 }
  0x17   : > { %p1212_p3 = por %p1169_p2, %p55_p12  ;;  %s43_s9 = ssub.s32 %s1100_s16, %s1333_s5 }
  0x18   : > { %p901_p5 = scmp.lt.s32.totalorder %s1104_s17, 5  ;;  %p46_p7 = scmp.eq.s32.totalorder %s43_s9, 0 }
  0x19   : > { %s192_s10 = sand.u32 1, %s1092_s14   ;;  %s791_s19 = sshll.u32 %s1100_s16, 6 }
  0x1a   : > { %s715_s11 = sshll.u32 %s192_s10, 6  ;;  %s202_s26 = scalar_lea.hbm %s1312_s0, %s791_s19 }
  0x1b   : > { %s1221_s18 = scalar_select %p46_p7, %s1092_s14, %s48_s6  }
  0x1c   : > { %s196_s28 = scalar_lea.vmem [#allocation3], %s715_s11  ;;  %s203_s21 = sshll.u32 %s202_s26, 4  ;;  %s204_s21 = int_to_ptr.hbm [resolvable:$true] %s203_s21 }
  0x1d   : > { %s205_s29 = sshll.u32 %s196_s28, 4  ;;  %p893_p2 = pnand %p901_p5, %p1206_p0  ;;  %s206_s29 = int_to_ptr.vmem [resolvable:$true] %s205_s29 }
  0x1e   : > { %s193_s30 = scalar_lea.sflag [#allocation4], %s192_s10  ;;  %s1326_s1 = smov 64  }
  0x1f   : > { %895 = dma.hbm_to_vmem [thread:$0]  (!%p893_p2), %s204_s21, 1024, %s206_s29, %s193_s30, %s1326_s1, %s1326_s1, %s1108_s4  }
  0x20   : > { %217 = sbr.rel (%p1188_p8) target bundleno = 238 (0xee), region = 32  ;;  %s1235_s6 = sand.u32 (!%p1188_p8), 1, %s1088_s13  }
  0x21   : > { %s719_s9 = sshll.u32 (!%p1188_p8), %s1235_s6, 6  ;;  %s220_s11 = scalar_lea.sflag (!%p1188_p8), [#allocation4], %s1235_s6 }
  0x22   : > { %s1241_s7 = scalar_lea.vmem (!%p1188_p8), [#allocation3], %s719_s9 }
  0x25   : > { %1071 = dma.done.wait (%p1175_p4), %s220_s11, 1024  }
  0x26   : > { %1073 = vsyncadd (%p1175_p4), %s220_s11, 4294966272 }
  0x27   : > { %1075 = dma.done.wait (%p1165_p1), [#allocation7], 1024  }
  0x28   : > { %1077 = vsyncadd (%p1165_p1), [#allocation7], 4294966272  ;;  %v807_v0 = vld [vmem:[#allocation6 + $0x38] sm:$0xff]  ;;  %v806_v1 = vld [vmem:[#allocation6 + $0x30] sm:$0xff]  ;;  %s1264_s22 = scalar_lea.vmem [#allocation8], %s719_s9  ;;  %s808_s27 = sshll.u32 %s1096_s15, 6 }
  0x29   : > { %425 = vmatpush.bf16.msra.mxu0 %v807_v0  ;;  %856 = vmatpush.bf16.msra.mxu1 %v807_v0  ;;  %v805_v2 = vld [vmem:[#allocation6 + $0x28] sm:$0xff]  ;;  %v804_v3 = vld [vmem:[#allocation6 + $0x20] sm:$0xff]  ;;  %v803_v4 = vld [vmem:[#allocation6 + $0x18] sm:$0xff]  ;;  %s590_s10 = scalar_lea.hbm %s1315_s3, %s808_s27  ;;  %s591_s19 = sshll.u32 %s1264_s22, 4  ;;  %s592_s19 = int_to_ptr.vmem [resolvable:$true] %s591_s19 }
  0x2a   : > { %857 = vmatpush.bf16.msra.mxu2 %v807_v0  ;;  %858 = vmatpush.bf16.msra.mxu3 %v807_v0  ;;  %v802_v5 = vld [vmem:[#allocation6 + $0x10] sm:$0xff]  ;;  %v801_v6 = vld [vmem:[#allocation6 + $0x8] sm:$0xff]  ;;  %v800_v7 = vld [vmem:[#allocation6] sm:$0xff]  ;;  %s593_s24 = sshll.u32 %s590_s10, 4  ;;  %s578_s15 = scalar_lea.sflag [#allocation5], %s1235_s6  ;;  %s594_s24 = int_to_ptr.hbm [resolvable:$true] %s593_s24 }
  0x2b   : > { %v792_v8 = vld [vmem:[%s1241_s7] sm:$0xff]  ;;  %v794_v9 = vld [vmem:[%s1241_s7 + $0x10] sm:$0xff]  ;;  %v793_v12 = vld [vmem:[%s1241_s7 + $0x8] sm:$0xff]  ;;  %s1032_s25 = sshra.s32 %s594_s24, 4  ;;  %s1038_s21 = scalar_lea.hbm %s1315_s3, 320  ;;  %s1033_s25 = int_to_ptr.hbm [resolvable:$true] %s1032_s25 }
  0x2c   : > { %v796_v10 = vld [vmem:[%s1241_s7 + $0x20] sm:$0xff]  ;;  %v798_v11 = vld [vmem:[%s1241_s7 + $0x30] sm:$0xff]  ;;  %v795_v13 = vld [vmem:[%s1241_s7 + $0x18] sm:$0xff]  ;;  %s1034_s26 = scalar_lea.hbm %s1033_s25, 64  ;;  %p1039_p9 = scmp.lt.s32.totalorder %s1033_s25, %s1315_s3 }
  0x2d   : > { %426 = vmatpush.bf16.msra.mxu0 %v806_v1  ;;  %859 = vmatpush.bf16.msra.mxu1 %v806_v1  ;;  %v797_v14 = vld [vmem:[%s1241_s7 + $0x28] sm:$0xff]  ;;  %v799_v15 = vld [vmem:[%s1241_s7 + $0x38] sm:$0xff]  ;;  %v957_v18 = vld [vmem:[%s1314_s2] ss:$0 sm:$0xff]  ;;  %p1035_p1 = scmp.ne.s32.totalorder %s1033_s25, %s1034_s26  ;;  %p1040_p10 = scmp.lt.s32.totalorder %s1038_s21, %s1034_s26 }
  0x2e   : > { %860 = vmatpush.bf16.msra.mxu2 %v806_v1  ;;  %861 = vmatpush.bf16.msra.mxu3 %v806_v1 }
  0x2f   : > { %p1036_p4 = pnand %p1035_p1, %p1212_p3  ;;  %p1041_p11 = por %p1040_p10, %p1039_p9 }
  0x31   : > { %427 = vmatpush.bf16.msra.mxu0 %v805_v2  ;;  %862 = vmatpush.bf16.msra.mxu1 %v805_v2  ;;  %p1037_p8 = pneg %p1036_p4 }
  0x32   : > { %863 = vmatpush.bf16.msra.mxu2 %v805_v2  ;;  %864 = vmatpush.bf16.msra.mxu3 %v805_v2 }
  0x33   : > { %p1042_p12 = pnand %p1041_p11, %p1037_p8 }
  0x35   : > { %428 = vmatpush.bf16.msra.mxu0 %v804_v3  ;;  %865 = vmatpush.bf16.msra.mxu1 %v804_v3 }
  0x36   : > { %866 = vmatpush.bf16.msra.mxu2 %v804_v3  ;;  %867 = vmatpush.bf16.msra.mxu3 %v804_v3 }
  0x39   : > { %429 = vmatpush.bf16.msra.mxu0 %v803_v4  ;;  %868 = vmatpush.bf16.msra.mxu1 %v803_v4 }
  0x3a   : > { %869 = vmatpush.bf16.msra.mxu2 %v803_v4  ;;  %870 = vmatpush.bf16.msra.mxu3 %v803_v4 }
  0x3d   : > { %430 = vmatpush.bf16.msra.mxu0 %v802_v5  ;;  %871 = vmatpush.bf16.msra.mxu1 %v802_v5 }
  0x3e   : > { %872 = vmatpush.bf16.msra.mxu2 %v802_v5  ;;  %873 = vmatpush.bf16.msra.mxu3 %v802_v5 }
  0x41   : > { %431 = vmatpush.bf16.msra.mxu0 %v801_v6  ;;  %874 = vmatpush.bf16.msra.mxu1 %v801_v6 }
  0x42   : > { %875 = vmatpush.bf16.msra.mxu2 %v801_v6  ;;  %876 = vmatpush.bf16.msra.mxu3 %v801_v6 }
  0x45   : > { %432 = vmatpush.bf16.msra.mxu0 %v800_v7  ;;  %877 = vmatpush.bf16.msra.mxu1 %v800_v7 }
  0x46   : > { %878 = vmatpush.bf16.msra.mxu2 %v800_v7  ;;  %879 = vmatpush.bf16.msra.mxu3 %v800_v7 }
  0x48   : > { %433 = vmatmul.bf16.vlgmr.msra.gmra.mxu0 %v792_v8  ;;  %443 = vmatmul.bf16.vlgmr.msra.gmra.mxu1 %v794_v9 }
  0x49   : > { %453 = vmatmul.bf16.vlgmr.msra.gmra.mxu2 %v796_v10  ;;  %463 = vmatmul.bf16.vlgmr.msra.gmra.mxu3 %v798_v11 }
  0x58   : > { %438 = vmatmul.bf16.gmra.mxu0 %v793_v12  ;;  %448 = vmatmul.bf16.gmra.mxu1 %v795_v13 }
  0x59   : > { %458 = vmatmul.bf16.gmra.mxu2 %v797_v14  ;;  %468 = vmatmul.bf16.gmra.mxu3 %v799_v15 }
  0xc5   : > { %v434_v16 = vpop.f32.mrf.mxu0  ;;  %v444_v17 = vpop.f32.mrf.mxu1 }
  0xc6   : > { %v529_v23 = vadd.f32 %v957_v18, %v434_v16  ;;  %v533_v24 = vadd.f32 %v957_v18, %v444_v17 }
  0xcc   : > { %v454_v19 = vpop.f32.mrf.mxu2  ;;  %v464_v20 = vpop.f32.mrf.mxu3 }
  0xcd   : > { %v436_v21 = vpop.f32.mrf.mxu0  ;;  %v446_v22 = vpop.f32.mrf.mxu1  ;;  %v537_v31 = vadd.f32 %v957_v18, %v454_v19  ;;  %v541_v32 = vadd.f32 %v957_v18, %v464_v20 }
  0xce   : > { %v530_v25 = vadd.f32 %v957_v18, %v436_v21  ;;  %v534_v26 = vadd.f32 %v957_v18, %v446_v22 }
  0xd0   : > { %v812_v27 = vpack.c.bf16 %v530_v25, %v529_v23  ;;  %v822_v28 = vpack.c.bf16 %v534_v26, %v533_v24 }
  0xd2   : > { %813 = vst [vmem:[%s1264_s22] sm:$0xff] %v812_v27  }
  0xd3   : > { %850 = vst [vmem:[%s1264_s22 + $0x10] sm:$0xff] %v822_v28  }
  0xd4   : > { %v456_v29 = vpop.f32.mrf.mxu2  ;;  %v466_v30 = vpop.f32.mrf.mxu3 }
  0xd5   : > { %v538_v33 = vadd.f32 %v957_v18, %v456_v29  ;;  %v542_v34 = vadd.f32 %v957_v18, %v466_v30  ;;  %v439_v35 = vpop.f32.mrf.mxu0  ;;  %v449_v36 = vpop.f32.mrf.mxu1 }
  0xd6   : > { %v531_v43 = vadd.f32 %v957_v18, %v439_v35  ;;  %v535_v44 = vadd.f32 %v957_v18, %v449_v36 }
  0xd7   : > { %v832_v37 = vpack.c.bf16 %v538_v33, %v537_v31  ;;  %v842_v38 = vpack.c.bf16 %v542_v34, %v541_v32 }
  0xd9   : > { %852 = vst [vmem:[%s1264_s22 + $0x20] sm:$0xff] %v832_v37  }
  0xda   : > { %854 = vst [vmem:[%s1264_s22 + $0x30] sm:$0xff] %v842_v38  }
  0xdc   : > { %v459_v39 = vpop.f32.mrf.mxu2  ;;  %v469_v40 = vpop.f32.mrf.mxu3 }
  0xdd   : > { %v441_v41 = vpop.f32.mrf.mxu0  ;;  %v451_v42 = vpop.f32.mrf.mxu1  ;;  %v539_v51 = vadd.f32 %v957_v18, %v459_v39  ;;  %v543_v52 = vadd.f32 %v957_v18, %v469_v40 }
  0xde   : > { %v532_v45 = vadd.f32 %v957_v18, %v441_v41  ;;  %v536_v46 = vadd.f32 %v957_v18, %v451_v42 }
  0xe0   : > { %v817_v47 = vpack.c.bf16 %v532_v45, %v531_v43  ;;  %v827_v48 = vpack.c.bf16 %v536_v46, %v535_v44 }
  0xe2   : > { %849 = vst [vmem:[%s1264_s22 + $0x8] sm:$0xff] %v817_v47  }
  0xe3   : > { %851 = vst [vmem:[%s1264_s22 + $0x18] sm:$0xff] %v827_v48  }
  0xe4   : > { %v461_v49 = vpop.f32.mrf.mxu2  ;;  %v471_v50 = vpop.f32.mrf.mxu3 }
  0xe5   : > { %v540_v53 = vadd.f32 %v957_v18, %v461_v49  ;;  %v544_v54 = vadd.f32 %v957_v18, %v471_v50 }
  0xe7   : > { %v837_v55 = vpack.c.bf16 %v540_v53, %v539_v51  ;;  %v847_v56 = vpack.c.bf16 %v544_v54, %v543_v52 }
  0xe9   : > { %853 = vst [vmem:[%s1264_s22 + $0x28] sm:$0xff] %v837_v55  }
  0xea   : > { %855 = vst [vmem:[%s1264_s22 + $0x38] sm:$0xff] %v847_v56  }
  0xeb   : > { %1045 = shalt.err (!%p1042_p12)
}
  0xec   : > { %s1109_s6 = smov 64   ;;  %s1110_s7 = smov 4  }
  0xed   : > { %886 = dma.vmem_to_hbm [thread:$0]  (%p1212_p3), %s592_s19, 1024, %s594_s24, %s578_s15, %s1109_s6, %s1109_s6, %s1110_s7  }
  0xee PF: > { %p903_p13 = scmp.ge.s32.totalorder %s1104_s17, 2  ;;  %s608_s1 = sand.u32 1, %s1084_s12  }
  0xef   : > { %s609_s20 = scalar_lea.sflag [#allocation5], %s608_s1 }
  0xf0   : > { %p897_p0 = pnand %p903_p13, %p1180_p6 }
  0xf2   : > { %p898_p5 = pneg %p897_p0 }
  0xf4   : > { %1079 = dma.done.wait (%p898_p5), %s609_s20, 1024  }
  0xf5   : > { %1081 = vsyncadd (%p898_p5), %s609_s20, 4294966272  ;;  %s20_s17 = sadd.s32 1, %s1104_s17   ;;  %s1327_s12 = smov %s1088_s13 }
  0xf6   : > { %p17_p7 = scmp.ge.s32.totalorder %s20_s17, 7   ;;  %s1328_s13 = smov %s1092_s14 }
  0xf7   : > { %s1329_s14 = smov %s1221_s18  ;;  %s1330_s15 = smov %s1100_s16 }
  0xf8   : > { %s1331_s16 = smov %s1333_s5  ;;  %19 = sbr.rel (!%p17_p7) target bundleno = 9 (0x9), region = 93 }
  0xfd   :  { %615 = vsyncpa [#allocation4], 1 }
  0xfe   :  { %617 = vsyncpa [#allocation4 + $0x1], 1 }
  0xff   :  { %618 = vsyncpa [#allocation7], 1 }
 0x100   :  { %619 = vsyncpa [#allocation5], 1 }
 0x101   :  { %621 = vsyncpa [#allocation5 + $0x1], 1 }

</bundles_post_ra>
